<compile_context>
chip_gen: v6e
topology: v6e:2x2x1
jax: 0.10.0
libtpu: 0.0.40
codegen_flags: <defaults>
</compile_context>

<pallas_src>
import functools
import math

import jax
import jax.numpy as jnp
from jax.experimental import pallas as pl
from jax.experimental.pallas import tpu as pltpu


# ----------------------------------------------------------------------------
# Kernel bodies
# ----------------------------------------------------------------------------
def _attend_and_project(qp, kp, vp, wo_t_ref, bo_ref, o_ref, *,
                        num_heads, seq_len, approx_recip, cdt):
    """Per-head attention + fused output projection for one batch block.

    qp/kp/vp: (N, D) f32 projected activations, N = block_batch * seq_len.
    The output projection is accumulated head-by-head in f32 registers
    (no ctx scratch, no masked hd-wide lane stores); one full-width store.
    """
    N, D = qp.shape
    b_blk = N // seq_len
    hd = D // num_heads

    qp3 = qp.reshape(b_blk, seq_len, D).astype(cdt)
    vp3 = vp.reshape(b_blk, seq_len, D).astype(cdt)
    # Hoist the K transpose out of the head loop: one (b, L, D) -> (b, D, L)
    # relayout per block (done in f32, then cast) instead of H per-head ones.
    kp3_t = jnp.swapaxes(kp.reshape(b_blk, seq_len, D), 1, 2).astype(cdt)

    wo_t = wo_t_ref[...]                       # (D, D), already (in, out) oriented

    # TODO(synk): for large L tile the key axis with an online-softmax (flash)
    # accumulator instead of materializing the full (b_blk, L, L) score tensor
    # (needed to stay inside v7x's 64 MiB VMEM at production sequence lengths).
    acc = jnp.zeros((N, D), jnp.float32)
    for h in range(num_heads):                 # H is small; static unroll
        sl = slice(h * hd, (h + 1) * hd)
        qh = qp3[:, :, sl]                     # (b, L, hd)   lane slice
        kh_t = kp3_t[:, sl, :]                 # (b, hd, L)   sublane slice
        vh = vp3[:, :, sl]                     # (b, L, hd)
        # 1/sqrt(hd) is pre-folded into the Q projection weights/bias.
        s = jnp.einsum("bqd,bdk->bqk", qh, kh_t,
                       preferred_element_type=jnp.float32)
        s = s - jnp.max(s, axis=-1, keepdims=True)        # stable softmax, f32
        p = jnp.exp(s)
        p = p * pl.reciprocal(jnp.sum(p, axis=-1, keepdims=True),
                              approx=approx_recip)
        ctx_h = jnp.einsum("bqk,bkd->bqd", p.astype(cdt), vh,
                           preferred_element_type=jnp.float32)
        # Fused out-projection: (N, hd) @ (hd, D), f32 accumulation.
        acc = acc + jnp.dot(ctx_h.reshape(N, hd).astype(cdt), wo_t[sl, :],
                            preferred_element_type=jnp.float32)

    o_ref[...] = (acc + bo_ref[...]).astype(o_ref.dtype)


def _mha_self_kernel(q_ref, w_in_ref, b_in_ref, wo_t_ref, bo_ref, o_ref, *,
                     num_heads, seq_len, approx_recip):
    """Self-attention (Q == K == V): only Q is streamed; fused QKV projection."""
    D = wo_t_ref.shape[0]
    cdt = w_in_ref.dtype
    qkv = jnp.dot(q_ref[...], w_in_ref[...],
                  preferred_element_type=jnp.float32) + b_in_ref[...]
    _attend_and_project(qkv[:, :D], qkv[:, D:2 * D], qkv[:, 2 * D:],
                        wo_t_ref, bo_ref, o_ref, num_heads=num_heads,
                        seq_len=seq_len, approx_recip=approx_recip, cdt=cdt)


def _mha_cross_kernel(q_ref, k_ref, v_ref, w_in_ref, b_in_ref, wo_t_ref, bo_ref,
                      o_ref, *, num_heads, seq_len, approx_recip):
    """General cross-attention: Q, K, V streamed separately."""
    D = wo_t_ref.shape[0]
    cdt = w_in_ref.dtype
    w_in = w_in_ref[...]
    b_in = b_in_ref[...]
    qp = jnp.dot(q_ref[...], w_in[:, :D],
                 preferred_element_type=jnp.float32) + b_in[:, :D]
    kp = jnp.dot(k_ref[...], w_in[:, D:2 * D],
                 preferred_element_type=jnp.float32) + b_in[:, D:2 * D]
    vp = jnp.dot(v_ref[...], w_in[:, 2 * D:],
                 preferred_element_type=jnp.float32) + b_in[:, 2 * D:]
    _attend_and_project(qp, kp, vp, wo_t_ref, bo_ref, o_ref, num_heads=num_heads,
                        seq_len=seq_len, approx_recip=approx_recip, cdt=cdt)


# ----------------------------------------------------------------------------
# Wrapper-side tiling / budgeting helpers
# ----------------------------------------------------------------------------
def _pick_block_batch(B, L, D, in_itemsize, out_itemsize, n_stream_in):
    """Largest batch block that (a) keeps block rows a multiple of the sublane
    packing (8 for f32, 16 for bf16) or covers the full batch, (b) keeps the
    streamed bytes per grid step within ~4 MiB, and (c) yields as many grid
    steps as possible (capped at 8) for DMA/compute overlap + megacore."""
    row_mult = 16 if in_itemsize < 4 else 8
    feasible = [bb for bb in range(1, B + 1)
                if B % bb == 0 and ((bb * L) % row_mult == 0 or bb == B)]

    def step_bytes(bb):
        return bb * L * D * (n_stream_in * in_itemsize + out_itemsize)

    budget = 4 << 20
    fits = [bb for bb in feasible if step_bytes(bb) <= budget] or [min(feasible)]
    best_steps = max(min(B // bb, 8) for bb in fits)
    fits = [bb for bb in fits if min(B // bb, 8) == best_steps]
    return max(fits)


def _vmem_limit_bytes(n_rows, b_blk, L, D, in_itemsize, w_itemsize, n_stream_in):
    """Generous per-kernel VMEM budget derived from the chosen block sizes."""
    stream = n_rows * D * (n_stream_in * in_itemsize + 4)      # in blocks + f32 out
    weights = (3 * D * D + D * D) * w_itemsize + 4 * D * 4     # fused W_in, W_o, biases
    inter = n_rows * 3 * D * (4 + w_itemsize)                  # qkv f32 + cdt copies
    inter += n_rows * D * 8                                    # acc f32 + staged out
    inter += b_blk * L * L * 4 * 3                             # score/prob tensors
    est = 2 * stream + weights + 2 * inter                     # double-buffer + headroom
    return int(min(64 << 20, max(16 << 20, est)))              # 64 MiB cap (v7x physical)


# ----------------------------------------------------------------------------
# Public entry point
# ----------------------------------------------------------------------------
def multihead_attention(Q, K, V, params, num_heads, *, block_batch=None,
                        matmul_dtype=jnp.bfloat16, is_self_attention=None):
    """Q, K, V: (B, L, D). params: (wq, wk, wv, bq, bk, bv, wo, bo) in PyTorch
    nn.Linear orientation (weights (out, in), biases (1, out))."""
    B, L, D = Q.shape
    assert D % num_heads == 0
    wq, wk, wv, bq, bk, bv, wo, bo = params
    hd = D // num_heads
    scale = 1.0 / math.sqrt(hd)

    if is_self_attention is None:
        # Fallback identity check; callers (e.g. PatchTST) should pass the flag.
        is_self_attention = (Q is K) and (K is V)

    # Host-side (free) weight prep: transpose to (in, out), fuse Q/K/V weights
    # into one (D, 3D) slab, fold 1/sqrt(hd) into the Q weights/bias, cast MXU
    # operands to matmul_dtype (biases stay f32 for f32 accumulation).
    w_in = jnp.concatenate([wq.T * scale, wk.T, wv.T], axis=1).astype(matmul_dtype)
    b_in = jnp.concatenate([bq * scale, bk, bv], axis=-1).astype(jnp.float32)
    wo_t = wo.T.astype(matmul_dtype)
    bo_f = bo.astype(jnp.float32)

    in_dtype = matmul_dtype                    # stream activations in MXU dtype
    in_itemsize = jnp.dtype(in_dtype).itemsize
    out_itemsize = jnp.dtype(Q.dtype).itemsize
    w_itemsize = jnp.dtype(matmul_dtype).itemsize
    n_stream_in = 1 if is_self_attention else 3

    if block_batch is None:
        block_batch = _pick_block_batch(B, L, D, in_itemsize, out_itemsize,
                                        n_stream_in)
    assert B % block_batch == 0
    n_rows = block_batch * L
    row_mult = 16 if in_itemsize < 4 else 8
    assert n_rows % row_mult == 0 or block_batch == B, (
        "block_batch * L must be a multiple of the sublane packing "
        "(8 for f32, 16 for bf16) or cover the full batch")
    num_blocks = B // block_batch

    # Flatten (B, L) -> rows (free) and cast to the streamed dtype host-side.
    Qf = Q.reshape(B * L, D).astype(in_dtype)

    row_spec = pl.BlockSpec((n_rows, D), lambda i: (i, 0))
    w_in_spec = pl.BlockSpec((D, 3 * D), lambda i: (0, 0))
    b_in_spec = pl.BlockSpec((1, 3 * D), lambda i: (0, 0))
    wo_spec = pl.BlockSpec((D, D), lambda i: (0, 0))
    bo_spec = pl.BlockSpec((1, D), lambda i: (0, 0))

    vmem_limit = _vmem_limit_bytes(n_rows, block_batch, L, D, in_itemsize,
                                   w_itemsize, n_stream_in)
    compiler_params = pltpu.CompilerParams(
        dimension_semantics=("parallel",), vmem_limit_bytes=vmem_limit)
    approx_recip = bool(jnp.dtype(matmul_dtype) != jnp.dtype(jnp.float32))

    if is_self_attention:
        # PatchTST path: K/V never cross HBM->VMEM at all.
        kernel = functools.partial(_mha_self_kernel, num_heads=num_heads,
                                   seq_len=L, approx_recip=approx_recip)
        in_specs = [row_spec, w_in_spec, b_in_spec, wo_spec, bo_spec]
        args = (Qf, w_in, b_in, wo_t, bo_f)
    else:
        Kf = K.reshape(B * L, D).astype(in_dtype)
        Vf = V.reshape(B * L, D).astype(in_dtype)
        kernel = functools.partial(_mha_cross_kernel, num_heads=num_heads,
                                   seq_len=L, approx_recip=approx_recip)
        in_specs = [row_spec, row_spec, row_spec,
                    w_in_spec, b_in_spec, wo_spec, bo_spec]
        args = (Qf, Kf, Vf, w_in, b_in, wo_t, bo_f)

    out2d = pl.pallas_call(
        kernel,
        out_shape=jax.ShapeDtypeStruct((B * L, D), Q.dtype),
        grid_spec=pltpu.PrefetchScalarGridSpec(
            num_scalar_prefetch=0,
            grid=(num_blocks,),
            in_specs=in_specs,
            out_specs=row_spec,
        ),
        compiler_params=compiler_params,
    )(*args)

    return out2d.reshape(B, L, D)


# ----------------------------------------------------------------------------
# Pure-JAX reference (mirrors torch.nn.MultiheadAttention forward, f32)
# ----------------------------------------------------------------------------
def _reference(Q, K, V, params, num_heads):
    wq, wk, wv, bq, bk, bv, wo, bo = params
    B, L, D = Q.shape
    hd = D // num_heads
    qp = Q @ wq.T + bq
    kp = K @ wk.T + bk
    vp = V @ wv.T + bv
    qp = qp.reshape(B, L, num_heads, hd).transpose(0, 2, 1, 3)
    kp = kp.reshape(B, L, num_heads, hd).transpose(0, 2, 1, 3)
    vp = vp.reshape(B, L, num_heads, hd).transpose(0, 2, 1, 3)
    s = jnp.einsum("bhqd,bhkd->bhqk", qp, kp) / (hd ** 0.5)
    p = jax.nn.softmax(s, axis=-1)
    ctx = jnp.einsum("bhqk,bhkd->bhqd", p, vp)
    ctx = ctx.transpose(0, 2, 1, 3).reshape(B, L, D)
    return ctx @ wo.T + bo


if __name__ == "__main__":
    B, L, D, H = 4, 8, 32, 4  # batch, num_patches, d_model, num_heads

    key = jax.random.PRNGKey(0)
    keys = jax.random.split(key, 12)

    Q = jax.random.normal(keys[0], (B, L, D), jnp.float32)
    K = jax.random.normal(keys[1], (B, L, D), jnp.float32)
    V = jax.random.normal(keys[2], (B, L, D), jnp.float32)
    X = jax.random.normal(keys[3], (B, L, D), jnp.float32)   # self-attention input

    # nn.MultiheadAttention-shaped synthetic parameters:
    # in_proj split into 3 x (D, D) weights + 3 x (1, D) biases; out_proj (D, D)+(1, D).
    s = 1.0 / (D ** 0.5)
    wq = jax.random.normal(keys[4], (D, D), jnp.float32) * s
    wk = jax.random.normal(keys[5], (D, D), jnp.float32) * s
    wv = jax.random.normal(keys[6], (D, D), jnp.float32) * s
    wo = jax.random.normal(keys[7], (D, D), jnp.float32) * s
    bq = jax.random.normal(keys[8], (1, D), jnp.float32) * 0.1
    bk = jax.random.normal(keys[9], (1, D), jnp.float32) * 0.1
    bv = jax.random.normal(keys[10], (1, D), jnp.float32) * 0.1
    bo = jax.random.normal(keys[11], (1, D), jnp.float32) * 0.1
    params = (wq, wk, wv, bq, bk, bv, wo, bo)

    ref_sa = _reference(X, X, X, params, H)

    # 1) Self-attention (PatchTST call pattern), Q-only DMA, bf16 MXU matmuls.
    out_sa = multihead_attention(X, X, X, params, num_heads=H,
                                 is_self_attention=True)
    out_sa = jax.block_until_ready(out_sa)
    assert out_sa.shape == (B, L, D)
    assert jnp.allclose(out_sa, ref_sa, atol=5e-2, rtol=5e-2), "self-attn (bf16) mismatch"

    # 2) Self-attention, f32 matmuls, strict parity check of the fused path.
    out_sa32 = multihead_attention(X, X, X, params, num_heads=H,
                                   matmul_dtype=jnp.float32, is_self_attention=True)
    out_sa32 = jax.block_until_ready(out_sa32)
    assert jnp.allclose(out_sa32, ref_sa, atol=1e-4, rtol=1e-4), "self-attn (f32) mismatch"

    # 3) General cross-attention path, f32 matmuls, strict tolerance.
    out = multihead_attention(Q, K, V, params, num_heads=H,
                              matmul_dtype=jnp.float32, is_self_attention=False)
    out = jax.block_until_ready(out)
    ref = _reference(Q, K, V, params, H)
    assert out.shape == (B, L, D)
    assert jnp.allclose(out, ref, atol=1e-4, rtol=1e-4), "cross-attn (f32) mismatch"

    print("KERNEL_OK")
</pallas_src>

<mosaic_0001>
module attributes {stable_mosaic.version = 11 : i64} {
  func.func @_mha_self_kernel(%arg0: i32, %arg1: memref<16x32xbf16, #tpu.memory_space<vmem>>, %arg2: memref<32x96xbf16, #tpu.memory_space<vmem>>, %arg3: memref<1x96xf32, #tpu.memory_space<vmem>>, %arg4: memref<32x32xbf16, #tpu.memory_space<vmem>>, %arg5: memref<1x32xf32, #tpu.memory_space<vmem>>, %arg6: memref<16x32xf32, #tpu.memory_space<vmem>>) attributes {dimension_semantics = [#tpu.dimension_semantics<parallel>], iteration_bounds = array<i64: 2>, scalar_prefetch = 0 : i64, scratch_operands = 0 : i64, tpu.core_type = #tpu.core_type<tc>, window_params = [{transform_indices = @transform_0, window_bounds = array<i64: 16, 32>}, {pipeline_mode = #tpu.pipeline_mode<synchronous>, transform_indices = @transform_1, window_bounds = array<i64: 32, 96>}, {pipeline_mode = #tpu.pipeline_mode<synchronous>, transform_indices = @transform_2, window_bounds = array<i64: 1, 96>}, {pipeline_mode = #tpu.pipeline_mode<synchronous>, transform_indices = @transform_3, window_bounds = array<i64: 32, 32>}, {pipeline_mode = #tpu.pipeline_mode<synchronous>, transform_indices = @transform_4, window_bounds = array<i64: 1, 32>}, {transform_indices = @transform_5, window_bounds = array<i64: 16, 32>}]} {
    %c0 = arith.constant 0 : index
    %c0_0 = arith.constant 0 : index
    %0 = vector.load %arg1[%c0, %c0_0] : memref<16x32xbf16, #tpu.memory_space<vmem>>, vector<16x32xbf16>
    %c0_1 = arith.constant 0 : index
    %c0_2 = arith.constant 0 : index
    %1 = vector.load %arg2[%c0_1, %c0_2] : memref<32x96xbf16, #tpu.memory_space<vmem>>, vector<32x96xbf16>
    %cst = arith.constant dense<0.000000e+00> : vector<16x96xf32>
    %2 = tpu.matmul %0, %1, %cst {dimension_numbers = #tpu.dot_dimension_numbers<[1], [0], [0], [1], [0, 0, 1, 1], [], []>} : vector<16x32xbf16>, vector<32x96xbf16>, vector<16x96xf32> -> vector<16x96xf32>
    %c0_3 = arith.constant 0 : index
    %c0_4 = arith.constant 0 : index
    %3 = vector.load %arg3[%c0_3, %c0_4] : memref<1x96xf32, #tpu.memory_space<vmem>>, vector<1x96xf32>
    %4 = vector.broadcast %3 : vector<1x96xf32> to vector<16x96xf32>
    %5 = arith.addf %2, %4 : vector<16x96xf32>
    %6 = vector.extract_strided_slice %5 {offsets = [0, 0], sizes = [16, 32], strides = [1, 1]} : vector<16x96xf32> to vector<16x32xf32>
    %7 = vector.extract_strided_slice %5 {offsets = [0, 32], sizes = [16, 32], strides = [1, 1]} : vector<16x96xf32> to vector<16x32xf32>
    %8 = vector.extract_strided_slice %5 {offsets = [0, 64], sizes = [16, 32], strides = [1, 1]} : vector<16x96xf32> to vector<16x32xf32>
    %9 = vector.shape_cast %6 : vector<16x32xf32> to vector<2x8x32xf32>
    %10 = arith.truncf %9 : vector<2x8x32xf32> to vector<2x8x32xbf16>
    %11 = vector.shape_cast %8 : vector<16x32xf32> to vector<2x8x32xf32>
    %12 = arith.truncf %11 : vector<2x8x32xf32> to vector<2x8x32xbf16>
    %13 = vector.shape_cast %7 : vector<16x32xf32> to vector<2x8x32xf32>
    %14 = tpu.transpose %13, [0, 2, 1] : vector<2x8x32xf32> -> vector<2x32x8xf32>
    %15 = arith.truncf %14 : vector<2x32x8xf32> to vector<2x32x8xbf16>
    %c0_5 = arith.constant 0 : index
    %c0_6 = arith.constant 0 : index
    %16 = vector.load %arg4[%c0_5, %c0_6] : memref<32x32xbf16, #tpu.memory_space<vmem>>, vector<32x32xbf16>
    %cst_7 = arith.constant 0.000000e+00 : f32
    %17 = vector.broadcast %cst_7 : f32 to vector<16x32xf32>
    %18 = vector.extract_strided_slice %10 {offsets = [0, 0, 0], sizes = [2, 8, 8], strides = [1, 1, 1]} : vector<2x8x32xbf16> to vector<2x8x8xbf16>
    %19 = vector.extract_strided_slice %15 {offsets = [0, 0, 0], sizes = [2, 8, 8], strides = [1, 1, 1]} : vector<2x32x8xbf16> to vector<2x8x8xbf16>
    %20 = vector.extract_strided_slice %12 {offsets = [0, 0, 0], sizes = [2, 8, 8], strides = [1, 1, 1]} : vector<2x8x32xbf16> to vector<2x8x8xbf16>
    "tpu.trace_start"() <{level = 10 : i32, message = "bqd,bdk->bqk"}> : () -> ()
    %cst_8 = arith.constant dense<0.000000e+00> : vector<2x8x8xf32>
    %21 = tpu.matmul %18, %19, %cst_8 {dimension_numbers = #tpu.dot_dimension_numbers<[2], [1], [1], [2], [0, 0, 0, 1, 1, 2], [0], [0]>} : vector<2x8x8xbf16>, vector<2x8x8xbf16>, vector<2x8x8xf32> -> vector<2x8x8xf32>
    "tpu.trace_stop"() : () -> ()
    %cst_9 = arith.constant dense<0xFF800000> : vector<2x8xf32>
    %22 = vector.multi_reduction <maximumf>, %21, %cst_9 [2] : vector<2x8x8xf32> to vector<2x8xf32>
    %23 = vector.shape_cast %22 : vector<2x8xf32> to vector<2x8x1xf32>
    %24 = vector.broadcast %23 : vector<2x8x1xf32> to vector<2x8x8xf32>
    %25 = arith.subf %21, %24 : vector<2x8x8xf32>
    %26 = math.exp %25 : vector<2x8x8xf32>
    %cst_10 = arith.constant dense<0.000000e+00> : vector<2x8xf32>
    %27 = vector.multi_reduction <add>, %26, %cst_10 [2] : vector<2x8x8xf32> to vector<2x8xf32>
    %28 = vector.shape_cast %27 : vector<2x8xf32> to vector<2x8x1xf32>
    %29 = tpu.reciprocal %28 {approx = true} : vector<2x8x1xf32> -> vector<2x8x1xf32>
    %30 = vector.broadcast %29 : vector<2x8x1xf32> to vector<2x8x8xf32>
    %31 = arith.mulf %26, %30 : vector<2x8x8xf32>
    %32 = arith.truncf %31 : vector<2x8x8xf32> to vector<2x8x8xbf16>
    "tpu.trace_start"() <{level = 10 : i32, message = "bqk,bkd->bqd"}> : () -> ()
    %cst_11 = arith.constant dense<0.000000e+00> : vector<2x8x8xf32>
    %33 = tpu.matmul %32, %20, %cst_11 {dimension_numbers = #tpu.dot_dimension_numbers<[2], [1], [1], [2], [0, 0, 0, 1, 1, 2], [0], [0]>} : vector<2x8x8xbf16>, vector<2x8x8xbf16>, vector<2x8x8xf32> -> vector<2x8x8xf32>
    "tpu.trace_stop"() : () -> ()
    %34 = vector.shape_cast %33 : vector<2x8x8xf32> to vector<16x8xf32>
    %35 = arith.truncf %34 : vector<16x8xf32> to vector<16x8xbf16>
    %36 = vector.extract_strided_slice %16 {offsets = [0, 0], sizes = [8, 32], strides = [1, 1]} : vector<32x32xbf16> to vector<8x32xbf16>
    %cst_12 = arith.constant dense<0.000000e+00> : vector<16x32xf32>
    %37 = tpu.matmul %35, %36, %cst_12 {dimension_numbers = #tpu.dot_dimension_numbers<[1], [0], [0], [1], [0, 0, 1, 1], [], []>} : vector<16x8xbf16>, vector<8x32xbf16>, vector<16x32xf32> -> vector<16x32xf32>
    %38 = arith.addf %17, %37 : vector<16x32xf32>
    %39 = vector.extract_strided_slice %10 {offsets = [0, 0, 8], sizes = [2, 8, 8], strides = [1, 1, 1]} : vector<2x8x32xbf16> to vector<2x8x8xbf16>
    %40 = vector.extract_strided_slice %15 {offsets = [0, 8, 0], sizes = [2, 8, 8], strides = [1, 1, 1]} : vector<2x32x8xbf16> to vector<2x8x8xbf16>
    %41 = vector.extract_strided_slice %12 {offsets = [0, 0, 8], sizes = [2, 8, 8], strides = [1, 1, 1]} : vector<2x8x32xbf16> to vector<2x8x8xbf16>
    "tpu.trace_start"() <{level = 10 : i32, message = "bqd,bdk->bqk"}> : () -> ()
    %cst_13 = arith.constant dense<0.000000e+00> : vector<2x8x8xf32>
    %42 = tpu.matmul %39, %40, %cst_13 {dimension_numbers = #tpu.dot_dimension_numbers<[2], [1], [1], [2], [0, 0, 0, 1, 1, 2], [0], [0]>} : vector<2x8x8xbf16>, vector<2x8x8xbf16>, vector<2x8x8xf32> -> vector<2x8x8xf32>
    "tpu.trace_stop"() : () -> ()
    %cst_14 = arith.constant dense<0xFF800000> : vector<2x8xf32>
    %43 = vector.multi_reduction <maximumf>, %42, %cst_14 [2] : vector<2x8x8xf32> to vector<2x8xf32>
    %44 = vector.shape_cast %43 : vector<2x8xf32> to vector<2x8x1xf32>
    %45 = vector.broadcast %44 : vector<2x8x1xf32> to vector<2x8x8xf32>
    %46 = arith.subf %42, %45 : vector<2x8x8xf32>
    %47 = math.exp %46 : vector<2x8x8xf32>
    %cst_15 = arith.constant dense<0.000000e+00> : vector<2x8xf32>
    %48 = vector.multi_reduction <add>, %47, %cst_15 [2] : vector<2x8x8xf32> to vector<2x8xf32>
    %49 = vector.shape_cast %48 : vector<2x8xf32> to vector<2x8x1xf32>
    %50 = tpu.reciprocal %49 {approx = true} : vector<2x8x1xf32> -> vector<2x8x1xf32>
    %51 = vector.broadcast %50 : vector<2x8x1xf32> to vector<2x8x8xf32>
    %52 = arith.mulf %47, %51 : vector<2x8x8xf32>
    %53 = arith.truncf %52 : vector<2x8x8xf32> to vector<2x8x8xbf16>
    "tpu.trace_start"() <{level = 10 : i32, message = "bqk,bkd->bqd"}> : () -> ()
    %cst_16 = arith.constant dense<0.000000e+00> : vector<2x8x8xf32>
    %54 = tpu.matmul %53, %41, %cst_16 {dimension_numbers = #tpu.dot_dimension_numbers<[2], [1], [1], [2], [0, 0, 0, 1, 1, 2], [0], [0]>} : vector<2x8x8xbf16>, vector<2x8x8xbf16>, vector<2x8x8xf32> -> vector<2x8x8xf32>
    "tpu.trace_stop"() : () -> ()
    %55 = vector.shape_cast %54 : vector<2x8x8xf32> to vector<16x8xf32>
    %56 = arith.truncf %55 : vector<16x8xf32> to vector<16x8xbf16>
    %57 = vector.extract_strided_slice %16 {offsets = [8, 0], sizes = [8, 32], strides = [1, 1]} : vector<32x32xbf16> to vector<8x32xbf16>
    %cst_17 = arith.constant dense<0.000000e+00> : vector<16x32xf32>
    %58 = tpu.matmul %56, %57, %cst_17 {dimension_numbers = #tpu.dot_dimension_numbers<[1], [0], [0], [1], [0, 0, 1, 1], [], []>} : vector<16x8xbf16>, vector<8x32xbf16>, vector<16x32xf32> -> vector<16x32xf32>
    %59 = arith.addf %38, %58 : vector<16x32xf32>
    %60 = vector.extract_strided_slice %10 {offsets = [0, 0, 16], sizes = [2, 8, 8], strides = [1, 1, 1]} : vector<2x8x32xbf16> to vector<2x8x8xbf16>
    %61 = vector.extract_strided_slice %15 {offsets = [0, 16, 0], sizes = [2, 8, 8], strides = [1, 1, 1]} : vector<2x32x8xbf16> to vector<2x8x8xbf16>
    %62 = vector.extract_strided_slice %12 {offsets = [0, 0, 16], sizes = [2, 8, 8], strides = [1, 1, 1]} : vector<2x8x32xbf16> to vector<2x8x8xbf16>
    "tpu.trace_start"() <{level = 10 : i32, message = "bqd,bdk->bqk"}> : () -> ()
    %cst_18 = arith.constant dense<0.000000e+00> : vector<2x8x8xf32>
    %63 = tpu.matmul %60, %61, %cst_18 {dimension_numbers = #tpu.dot_dimension_numbers<[2], [1], [1], [2], [0, 0, 0, 1, 1, 2], [0], [0]>} : vector<2x8x8xbf16>, vector<2x8x8xbf16>, vector<2x8x8xf32> -> vector<2x8x8xf32>
    "tpu.trace_stop"() : () -> ()
    %cst_19 = arith.constant dense<0xFF800000> : vector<2x8xf32>
    %64 = vector.multi_reduction <maximumf>, %63, %cst_19 [2] : vector<2x8x8xf32> to vector<2x8xf32>
    %65 = vector.shape_cast %64 : vector<2x8xf32> to vector<2x8x1xf32>
    %66 = vector.broadcast %65 : vector<2x8x1xf32> to vector<2x8x8xf32>
    %67 = arith.subf %63, %66 : vector<2x8x8xf32>
    %68 = math.exp %67 : vector<2x8x8xf32>
    %cst_20 = arith.constant dense<0.000000e+00> : vector<2x8xf32>
    %69 = vector.multi_reduction <add>, %68, %cst_20 [2] : vector<2x8x8xf32> to vector<2x8xf32>
    %70 = vector.shape_cast %69 : vector<2x8xf32> to vector<2x8x1xf32>
    %71 = tpu.reciprocal %70 {approx = true} : vector<2x8x1xf32> -> vector<2x8x1xf32>
    %72 = vector.broadcast %71 : vector<2x8x1xf32> to vector<2x8x8xf32>
    %73 = arith.mulf %68, %72 : vector<2x8x8xf32>
    %74 = arith.truncf %73 : vector<2x8x8xf32> to vector<2x8x8xbf16>
    "tpu.trace_start"() <{level = 10 : i32, message = "bqk,bkd->bqd"}> : () -> ()
    %cst_21 = arith.constant dense<0.000000e+00> : vector<2x8x8xf32>
    %75 = tpu.matmul %74, %62, %cst_21 {dimension_numbers = #tpu.dot_dimension_numbers<[2], [1], [1], [2], [0, 0, 0, 1, 1, 2], [0], [0]>} : vector<2x8x8xbf16>, vector<2x8x8xbf16>, vector<2x8x8xf32> -> vector<2x8x8xf32>
    "tpu.trace_stop"() : () -> ()
    %76 = vector.shape_cast %75 : vector<2x8x8xf32> to vector<16x8xf32>
    %77 = arith.truncf %76 : vector<16x8xf32> to vector<16x8xbf16>
    %78 = vector.extract_strided_slice %16 {offsets = [16, 0], sizes = [8, 32], strides = [1, 1]} : vector<32x32xbf16> to vector<8x32xbf16>
    %cst_22 = arith.constant dense<0.000000e+00> : vector<16x32xf32>
    %79 = tpu.matmul %77, %78, %cst_22 {dimension_numbers = #tpu.dot_dimension_numbers<[1], [0], [0], [1], [0, 0, 1, 1], [], []>} : vector<16x8xbf16>, vector<8x32xbf16>, vector<16x32xf32> -> vector<16x32xf32>
    %80 = arith.addf %59, %79 : vector<16x32xf32>
    %81 = vector.extract_strided_slice %10 {offsets = [0, 0, 24], sizes = [2, 8, 8], strides = [1, 1, 1]} : vector<2x8x32xbf16> to vector<2x8x8xbf16>
    %82 = vector.extract_strided_slice %15 {offsets = [0, 24, 0], sizes = [2, 8, 8], strides = [1, 1, 1]} : vector<2x32x8xbf16> to vector<2x8x8xbf16>
    %83 = vector.extract_strided_slice %12 {offsets = [0, 0, 24], sizes = [2, 8, 8], strides = [1, 1, 1]} : vector<2x8x32xbf16> to vector<2x8x8xbf16>
    "tpu.trace_start"() <{level = 10 : i32, message = "bqd,bdk->bqk"}> : () -> ()
    %cst_23 = arith.constant dense<0.000000e+00> : vector<2x8x8xf32>
    %84 = tpu.matmul %81, %82, %cst_23 {dimension_numbers = #tpu.dot_dimension_numbers<[2], [1], [1], [2], [0, 0, 0, 1, 1, 2], [0], [0]>} : vector<2x8x8xbf16>, vector<2x8x8xbf16>, vector<2x8x8xf32> -> vector<2x8x8xf32>
    "tpu.trace_stop"() : () -> ()
    %cst_24 = arith.constant dense<0xFF800000> : vector<2x8xf32>
    %85 = vector.multi_reduction <maximumf>, %84, %cst_24 [2] : vector<2x8x8xf32> to vector<2x8xf32>
    %86 = vector.shape_cast %85 : vector<2x8xf32> to vector<2x8x1xf32>
    %87 = vector.broadcast %86 : vector<2x8x1xf32> to vector<2x8x8xf32>
    %88 = arith.subf %84, %87 : vector<2x8x8xf32>
    %89 = math.exp %88 : vector<2x8x8xf32>
    %cst_25 = arith.constant dense<0.000000e+00> : vector<2x8xf32>
    %90 = vector.multi_reduction <add>, %89, %cst_25 [2] : vector<2x8x8xf32> to vector<2x8xf32>
    %91 = vector.shape_cast %90 : vector<2x8xf32> to vector<2x8x1xf32>
    %92 = tpu.reciprocal %91 {approx = true} : vector<2x8x1xf32> -> vector<2x8x1xf32>
    %93 = vector.broadcast %92 : vector<2x8x1xf32> to vector<2x8x8xf32>
    %94 = arith.mulf %89, %93 : vector<2x8x8xf32>
    %95 = arith.truncf %94 : vector<2x8x8xf32> to vector<2x8x8xbf16>
    "tpu.trace_start"() <{level = 10 : i32, message = "bqk,bkd->bqd"}> : () -> ()
    %cst_26 = arith.constant dense<0.000000e+00> : vector<2x8x8xf32>
    %96 = tpu.matmul %95, %83, %cst_26 {dimension_numbers = #tpu.dot_dimension_numbers<[2], [1], [1], [2], [0, 0, 0, 1, 1, 2], [0], [0]>} : vector<2x8x8xbf16>, vector<2x8x8xbf16>, vector<2x8x8xf32> -> vector<2x8x8xf32>
    "tpu.trace_stop"() : () -> ()
    %97 = vector.shape_cast %96 : vector<2x8x8xf32> to vector<16x8xf32>
    %98 = arith.truncf %97 : vector<16x8xf32> to vector<16x8xbf16>
    %99 = vector.extract_strided_slice %16 {offsets = [24, 0], sizes = [8, 32], strides = [1, 1]} : vector<32x32xbf16> to vector<8x32xbf16>
    %cst_27 = arith.constant dense<0.000000e+00> : vector<16x32xf32>
    %100 = tpu.matmul %98, %99, %cst_27 {dimension_numbers = #tpu.dot_dimension_numbers<[1], [0], [0], [1], [0, 0, 1, 1], [], []>} : vector<16x8xbf16>, vector<8x32xbf16>, vector<16x32xf32> -> vector<16x32xf32>
    %101 = arith.addf %80, %100 : vector<16x32xf32>
    %c0_28 = arith.constant 0 : index
    %c0_29 = arith.constant 0 : index
    %102 = vector.load %arg5[%c0_28, %c0_29] : memref<1x32xf32, #tpu.memory_space<vmem>>, vector<1x32xf32>
    %103 = vector.broadcast %102 : vector<1x32xf32> to vector<16x32xf32>
    %104 = arith.addf %101, %103 : vector<16x32xf32>
    %c0_30 = arith.constant 0 : index
    %c0_31 = arith.constant 0 : index
    %105 = vector.load %arg6[%c0_30, %c0_31] : memref<16x32xf32, #tpu.memory_space<vmem>>, vector<16x32xf32>
    tpu.vector_store %arg6[%c0_30, %c0_31], %104 {strides = array<i32>} : memref<16x32xf32, #tpu.memory_space<vmem>>, vector<16x32xf32>,
    return
  }
  func.func @transform_0(%arg0: i32) -> (i32, i32) {
    %c0_i32 = arith.constant 0 : i32
    %c0_i32_0 = arith.constant 0 : i32
    return %arg0, %c0_i32 : i32, i32
  }
  func.func @transform_1(%arg0: i32) -> (i32, i32) {
    %c0_i32 = arith.constant 0 : i32
    %c0_i32_0 = arith.constant 0 : i32
    %c0_i32_1 = arith.constant 0 : i32
    return %c0_i32, %c0_i32_0 : i32, i32
  }
  func.func @transform_2(%arg0: i32) -> (i32, i32) {
    %c0_i32 = arith.constant 0 : i32
    %c0_i32_0 = arith.constant 0 : i32
    %c0_i32_1 = arith.constant 0 : i32
    return %c0_i32, %c0_i32_0 : i32, i32
  }
  func.func @transform_3(%arg0: i32) -> (i32, i32) {
    %c0_i32 = arith.constant 0 : i32
    %c0_i32_0 = arith.constant 0 : i32
    %c0_i32_1 = arith.constant 0 : i32
    return %c0_i32, %c0_i32_0 : i32, i32
  }
  func.func @transform_4(%arg0: i32) -> (i32, i32) {
    %c0_i32 = arith.constant 0 : i32
    %c0_i32_0 = arith.constant 0 : i32
    %c0_i32_1 = arith.constant 0 : i32
    return %c0_i32, %c0_i32_0 : i32, i32
  }
  func.func @transform_5(%arg0: i32) -> (i32, i32) {
    %c0_i32 = arith.constant 0 : i32
    %c0_i32_0 = arith.constant 0 : i32
    return %arg0, %c0_i32 : i32, i32
  }
}

</mosaic_0001>

<bundles_post_ra>
// kernel: tpu_custom_call.1
= control target key start
LH: loop header
LB: loop body
LE: loop exit
PB: predicated region body
PF: predicated region fallthrough
CT: control target
= control target key end

     0   :  { %10 = vsyncpa [#allocation3], 0  ;;  %s2537_s0 = inlined_call_operand.hbm [shape: bf16[32,32], index: 0, kind: input, shape index: {}]   ;;  %s2538_s1 = inlined_call_operand.hbm [shape: bf16[32,96], index: 1, kind: input, shape index: {}]   ;;  %s2539_s2 = inlined_call_operand.vmem [shape: f32[1,96], index: 2, kind: input, shape index: {}]   ;;  %s2540_s3 = inlined_call_operand.hbm [shape: bf16[32,32], index: 3, kind: input, shape index: {}]   ;;  %s2541_s4 = inlined_call_operand.vmem [shape: f32[1,32], index: 4, kind: input, shape index: {}]   ;;  %s2542_s5 = inlined_call_operand.hbm [shape: f32[32,32], index: 5, kind: output, shape index: {}]  }
   0x1   :  { %12 = vsyncpa [#allocation3 + $0x1], 0 }
   0x2   :  { %13 = vsyncpa [#allocation6], 0 }
   0x3   :  { %14 = vsyncpa [#allocation4], 0 }
   0x4   :  { %16 = vsyncpa [#allocation4 + $0x1], 0  ;;  %s2148_s18 = smov 0   ;;  %s2150_s19 = smov 0  }
   0x5   :  { %s2152_s20 = smov 0   ;;  %s2154_s21 = smov 0  }
   0x6 LB: > { %s2169_s22 = sadd.s32 4294967295, %s2098_s21   ;;  %s1617_s23 = sadd.s32 4294967294, %s2098_s21   ;;  %s2098_s21 = sphi %s2154_s21, %s2565_s21   ;;  %s2094_s20 = sphi %s2152_s20, %s2564_s20   ;;  %s2090_s19 = sphi %s2150_s19, %s2563_s19   ;;  %s2086_s18 = sphi %s2148_s18, %s2562_s18  }
   0x7   : > { %p42_p0 = scmp.ne.s32.totalorder %s2090_s19, %s2086_s18  ;;  %p2543_p1 = scmp.eq.s32.totalorder %s2169_s22, 0 }
   0x8   : > { %p150_p2 = scmp.eq.s32.totalorder %s2169_s22, 1  ;;  %p156_p3 = scmp.eq.s32.totalorder %s1617_s23, 1 }
   0x9   : > { %p2178_p4 = por %p2543_p1, %p42_p0  ;;  %p1618_p5 = scmp.ge.s32.totalorder %s2098_s21, 1 }
   0xa   : > { %p2183_p6 = por %p156_p3, %p42_p0  ;;  %p163_p7 = scmp.lt.s32.totalorder %s2098_s21, 3 }
   0xb   : > { %s2548_s24 = scalar_select %p2178_p4, 1, 0 }
   0xc   : > { %s2549_s25 = scalar_select %p2183_p6, 1, 0 }
   0xd   : > { %p2188_p8 = pnand %p1618_p5, %p163_p7  ;;  %s2100_s27 = smov [#allocation5]  }
   0xe   : > { %s175_s28 = sshll.u32 %s2100_s27, 4  ;;  %s2101_s30 = smov [#allocation7]   ;;  %s176_s28 = int_to_ptr.vmem [resolvable:$true] %s175_s28 }
   0xf   : > { %s2550_s26 = scalar_select %p2188_p8, 1, 0 }
  0x10   : > { %p1846_p9 = pneg %p2188_p8  ;;  %s191_s6 = sshll.u32 %s2101_s30, 4  ;;  %s192_s6 = int_to_ptr.vmem [resolvable:$true] %s191_s6 }
  0x11   : > { %s1961_s7 = scalar_lea.vmem %s176_s28, 256  ;;  %p1969_p5 = scmp.lt.s32.totalorder %s176_s28, %s176_s28 }
  0x12   : > { %p2197_p11 = pnand %p1846_p9, %p2543_p1  ;;  %p1962_p13 = scmp.ne.s32.totalorder %s176_s28, %s1961_s7 }
  0x13   : > { %p1970_p7 = scmp.lt.s32.totalorder %s1961_s7, %s1961_s7 }
  0x14   : > { %p1952_p12 = pneg %p2197_p11 }
  0x15   : > { %p1971_p10 = por %p1970_p7, %p1969_p5 }
  0x16   : > { %p1964_p0 = pnand %p1962_p13, %p1952_p12 }
  0x18   : > { %p1965_p3 = pneg %p1964_p0 }
  0x1a   : > { %p1972_p9 = pnand %p1971_p10, %p1965_p3 }
  0x1c   : > { %1975 = shalt.err (!%p1972_p9)
}
  0x1d   : > { %s2544_s8 = smov 64   ;;  %s2103_s9 = smov 4  }
  0x1e   : > { %1849 = dma.hbm_to_vmem [thread:$0]  (!%p2197_p11), %s2538_s1, 256, %s176_s28, [#allocation6], %s2544_s8, %s2544_s8, %s2103_s9  }
  0x1f   : > { %s1987_s12 = scalar_lea.vmem %s192_s6, 256  ;;  %p1995_p10 = scmp.lt.s32.totalorder %s192_s6, %s192_s6 }
  0x20   : > { %p1988_p13 = scmp.ne.s32.totalorder %s192_s6, %s1987_s12  ;;  %p1996_p3 = scmp.lt.s32.totalorder %s1987_s12, %s1987_s12 }
  0x22   : > { %p1990_p0 = pnand %p1988_p13, %p1952_p12  ;;  %p1997_p7 = por %p1996_p3, %p1995_p10 }
  0x24   : > { %p1991_p5 = pneg %p1990_p0 }
  0x26   : > { %p1998_p9 = pnand %p1997_p7, %p1991_p5 }
  0x28   : > { %2001 = shalt.err (!%p1998_p9)
}
  0x29   : > { %1852 = dma.hbm_to_vmem [thread:$0]  (!%p2197_p11), %s2540_s3, 256, %s192_s6, [#allocation6], %s2544_s8, %s2544_s8, %s2103_s9  }
  0x2a   : > { %s2226_s15 = sadd.s32 1, %s2098_s21   ;;  %s29_s16 = sadd.s32 1, %s2094_s20 }
  0x2b   : > { %s26_s17 = ssub.s32 %s2098_s21, %s2226_s15  ;;  %p36_p12 = scmp.ne.s32.totalorder %s2094_s20, %s2090_s19 }
  0x2c   : > { %p27_p13 = scmp.eq.s32.totalorder %s26_s17, 0  ;;  %p37_p0 = scmp.eq.s32.totalorder %s2098_s21, 0 }
  0x2d   : > { %p2236_p5 = por %p150_p2, %p36_p12  ;;  %p1863_p10 = scmp.lt.s32.totalorder %s2098_s21, 2 }
  0x2e   : > { %s2242_s27 = scalar_select %p27_p13, %s2094_s20, %s29_s16  }
  0x2f   : > { %s2552_s23 = scalar_select %p2236_p5, 1, 0 }
  0x30   : > { %p38_p3 = por %p37_p0, %p36_p12  ;;  %s208_s28 = sand.u32 1, %s2094_s20  }
  0x31   : > { %s1622_s29 = sshll.u32 %s208_s28, 3  ;;  %s1661_s30 = sshll.u32 %s2098_s21, 7 }
  0x32   : > { %s2249_s10 = scalar_lea.hbm %s2537_s0, %s1661_s30  ;;  %s212_s11 = scalar_lea.vmem [#allocation2], %s1622_s29 }
  0x33   : > { %s219_s12 = sshll.u32 %s212_s11, 4  ;;  %p2253_p2 = pnand %p1863_p10, %p38_p3  ;;  %s2251_s12 = int_to_ptr.vmem [resolvable:$true] %s219_s12 }
  0x34   : > { %s2257_s14 = scalar_lea.sflag [#allocation3], %s208_s28  ;;  %s2002_s16 = scalar_lea.hbm %s2249_s10, 128 }
  0x35   : > { %p2003_p11 = scmp.ne.s32.totalorder %s2249_s10, %s2002_s16  ;;  %p2004_p7 = pneg %p2253_p2 }
  0x36   : > { %s2007_s29 = scalar_lea.hbm %s2537_s0, 256  ;;  %p2008_p13 = scmp.lt.s32.totalorder %s2249_s10, %s2537_s0 }
  0x37   : > { %p2005_p9 = pnand %p2004_p7, %p2003_p11  ;;  %p2009_p0 = scmp.lt.s32.totalorder %s2007_s29, %s2002_s16 }
  0x39   : > { %p2006_p12 = pneg %p2005_p9  ;;  %p2010_p10 = por %p2009_p0, %p2008_p13 }
  0x3b   : > { %p2011_p3 = pnand %p2010_p10, %p2006_p12 }
  0x3d   : > { %2014 = shalt.err (!%p2011_p3)
}
  0x3e   : > { %s2015_s28 = scalar_lea.vmem %s2251_s12, 128  ;;  %s2104_s11 = smov [#allocation2]  }
  0x3f   : > { %p2016_p1 = scmp.ne.s32.totalorder %s2251_s12, %s2015_s28  ;;  %s2020_s8 = sshll.u32 %s2104_s11, 4  ;;  %s2021_s8 = int_to_ptr.vmem [resolvable:$false] %s2020_s8 }
  0x40   : > { %s2022_s17 = scalar_lea.vmem %s2021_s8, 256  ;;  %p2023_p9 = scmp.lt.s32.totalorder %s2251_s12, %s2021_s8 }
  0x41   : > { %p2018_p6 = pnand %p2016_p1, %p2004_p7  ;;  %p2024_p5 = scmp.lt.s32.totalorder %s2022_s17, %s2015_s28 }
  0x43   : > { %p2019_p11 = pneg %p2018_p6  ;;  %p2025_p4 = por %p2024_p5, %p2023_p9 }
  0x45   : > { %p2026_p8 = pnand %p2025_p4, %p2019_p11 }
  0x47   : > { %2029 = shalt.err (!%p2026_p8)
}
  0x48   : > { %s2554_s16 = smov 64   ;;  %p2555_p1 = scmp.ne.s32.totalorder %s2550_s26, 0 }
  0x49   : > { %1856 = dma.hbm_to_vmem [thread:$0]  (!%p2253_p2), %s2249_s10, 128, %s2251_s12, %s2257_s14, %s2554_s16, %s2554_s16, %s2103_s9  }
  0x4a   : > { %231 = sbr.rel (%p2555_p1) target bundleno = 3406 (0xd4e), region = 40  ;;  %s2284_s30 = sand.u32 (!%p2555_p1), 1, %s2090_s19  }
  0x4b   : > { %s1626_s8 = sshll.u32 (!%p2555_p1), %s2284_s30, 3  ;;  %s234_s29 = scalar_lea.sflag (!%p2555_p1), [#allocation3], %s2284_s30 }
  0x4c   : > { %s237_s6 = scalar_lea.vmem (!%p2555_p1), [#allocation2], %s1626_s8  ;;  %p2556_p4 = scmp.ne.s32.totalorder (!%p2555_p1), %s2548_s24, 0 }
  0x4f   : > { %2073 = dma.done.wait (%p2556_p4), %s234_s29, 128  }
  0x50   : > { %2075 = vsyncadd (%p2556_p4), %s234_s29, 4294967168  ;;  %p2557_p6 = scmp.eq.s32.totalorder %s2169_s22, 0 }
  0x52   : > { %2077 = dma.done.wait (%p2557_p6), [#allocation6], 512   ;;  %p2558_p8 = pmov %p2557_p6 }
  0x53   : > { %v2105_v0 = vmov 0.0   ;;  %vm2106_vm0 = vmmov 0   ;;  %v1915_v1 = vld [vmem:[#allocation5 + $0x8] sm:$0xff]   ;;  %v1916_v2 = vld [vmem:[#allocation5] sm:$0xff]   ;;  %v1917_v3 = vld [vmem:[%s237_s6] sm:$0xff]   ;;  %vm305_vm1 = vcmask 261120  }
  0x54   : > { %2079 = vsyncadd (%p2558_p8), [#allocation6], 4294966784  ;;  %1706 = vmatprep.subr.bf16.mxu0 %v2105_v0  ;;  %1710 = vmatprep.mubr.msk.bf16.mxu0 %vm2106_vm0, %v2105_v0  ;;  %v1630_v4 = vld [vmem:[%s2539_s2] ss:$0 sm:$0xff]  ;;  %s2107_s9 = smov 96   ;;  %vm436_vm2 = vcmask 1043456  }
  0x55   : > { %1714 = vmatprep.subr.bf16.mxu1 %v2105_v0  ;;  %1716 = vmatprep.mubr.msk.bf16.mxu1 %vm2106_vm0, %v2105_v0  ;;  %vm432_vm3 = vcmask 64512   ;;  %s2108_s10 = smov 64   ;;  %s2109_s12 = smov 120  }
  0x56   : > { %1707 = vmatpush3.bf16.msra.mxu0 %v1915_v1  ;;  %s2110_s13 = smov 56   ;;  %s2111_s14 = smov 112  }
  0x57   : > { %1708 = vmatprep.subr.bf16.mxu0 %v2105_v0  ;;  %s2112_s7 = smov 48   ;;  %s2113_s28 = smov 104  }
  0x58   : > { %s2114_s11 = smov 40   ;;  %s1629_s17 = sshll.u32 %s2284_s30, 4 }
  0x59   : > { %s1662_s29 = sshll.u32 %s2169_s22, 8  ;;  %s271_s6 = scalar_lea.vmem [#allocation8], %s1629_s17 }
  0x5a   : > { %1709 = vmatpush3.bf16.msra.mxu0 %v1916_v2  ;;  %s1525_s24 = sshll.u32 %s271_s6, 4  ;;  %s1512_s22 = scalar_lea.sflag [#allocation4], %s2284_s30  ;;  %s2493_s24 = int_to_ptr.vmem [resolvable:$true] %s1525_s24 }
  0x5b   : > { %1726 = vmatprep.subr.bf16.mxu0 %v2105_v0  ;;  %p2559_p2 = scmp.ne.s32.totalorder %s2552_s23, 0 }
  0x5d   : > { %1711 = vmatmul.mubr.msk.bf16.vlgmr.msra.gmra.mxu0 %vm305_vm1, %v1917_v3 }
  0x5e   : > { %1728 = vmatprep.mubr.msk.bf16.mxu0 %vm2106_vm0, %v2105_v0 }
 0x11d   : > { %v343_v5 = vpop.f32.mrf.mxu0 }
 0x11e   : > { %v344_v6 = vadd.f32 %v1630_v4, %v343_v5 }
 0x11f   : > { %v1712_v7 = vpop.f32.mrf.mxu0 }
 0x120   : > { %354 = vrot.lane.b32.xlu0 %v344_v6, %s2107_s9  ;;  %v2314_v18 = vpack.c.bf16 %v344_v6, %v344_v6 }
 0x121   : > { %v346_v8 = vpop.f32.mrf.mxu0 }
 0x122   : > { %v347_v9 = vadd.f32 %v1630_v4, %v346_v8 }
 0x123   : > { %v1713_v10 = vpop.f32.mrf.mxu0 }
 0x124   : > { %356 = vrot.lane.b32.xlu0 %v347_v9, %s2107_s9  ;;  %v2327_v25 = vpack.c.bf16 %v347_v9, %v347_v9 }
 0x192   : > { %v355_v11 = vpop.permute.xlu0 %354 }
 0x193   : > { %360 = vxpose.xlu1.b32.start.end [1/1] (short) (narrow) %v355_v11, 32 }
 0x196   : > { %v357_v12 = vpop.permute.xlu0 %356 }
 0x1a0   : > { %392 = vxpose.xlu1.b32.start.end [1/1] (short) (narrow) %v357_v12, 32 }
 0x20f   : > { %v376_v13 = vpop.trf.xlu1 }
 0x213   : > { %v377_v14 = vpop.trf.xlu1 }
 0x214   : > { %v2310_v15 = vpack.c.bf16 %v377_v14, %v376_v13 }
 0x216   : > { %v438_v16 = vsel %vm436_vm2, %v2310_v15, 0  ;;  %v652_v55 = vrot.slane %v2310_v15, 4 }
 0x217   : > { %1715 = vmatpush3.bf16.msra.mxu1 %v438_v16  ;;  %v378_v17 = vpop.trf.xlu1 }
 0x218   : > { %1720 = vmatprep.subr.bf16.mxu1 %v2105_v0  ;;  %v657_v58 = vsel %vm436_vm2, %v652_v55, 0 }
 0x21a   : > { %1717 = vmatmul.mubr.msk.bf16.vlgmr.msra.gmra.mxu1 %vm432_vm3, %v2314_v18 }
 0x21b   : > { %v379_v19 = vpop.trf.xlu1  ;;  %1722 = vmatprep.mubr.msk.bf16.mxu1 %vm2106_vm0, %v2105_v0 }
 0x21c   : > { %v2321_v20 = vpack.c.bf16 %v379_v19, %v378_v17 }
 0x21f   : > { %v408_v21 = vpop.trf.xlu1 }
 0x223   : > { %v409_v22 = vpop.trf.xlu1 }
 0x224   : > { %v2323_v23 = vpack.c.bf16 %v409_v22, %v408_v21 }
 0x226   : > { %v484_v24 = vsel %vm436_vm2, %v2323_v23, 0  ;;  %v702_v60 = vrot.slane %v2323_v23, 4 }
 0x227   : > { %1721 = vmatpush3.bf16.msra.mxu1 %v484_v24  ;;  %v2337_v39 = vpop.trf.xlu1 }
 0x228   : > { %1732 = vmatprep.subr.bf16.mxu1 %v2105_v0  ;;  %v707_v1 = vsel %vm436_vm2, %v702_v60, 0 }
 0x22a   : > { %1723 = vmatmul.mubr.msk.bf16.vlgmr.msra.gmra.mxu1 %vm432_vm3, %v2327_v25 }
 0x22b   : > { %1734 = vmatprep.mubr.msk.bf16.mxu1 %vm2106_vm0, %v2105_v0  ;;  %v2339_v40 = vpop.trf.xlu1 }
 0x2da   : > { %v474_v26 = vpop.f32.mrf.mxu1 }
 0x2db   : > { %v526_v27 = vsel %vm432_vm3, %v474_v26, -inf }
 0x2dc   : > { %v1718_v28 = vpop.f32.mrf.mxu1  ;;  %527 = vmax.xlane.f32.xlu0 %v526_v27 }
 0x2de   : > { %v477_v29 = vpop.f32.mrf.mxu1 }
 0x2e0   : > { %v1719_v30 = vpop.f32.mrf.mxu1 }
 0x2ea   : > { %v520_v31 = vpop.f32.mrf.mxu1 }
 0x2eb   : > { %v529_v32 = vsel %vm432_vm3, %v520_v31, -inf }
 0x2ec   : > { %530 = vmax.xlane.f32.xlu1 %v529_v32  ;;  %v1724_v33 = vpop.f32.mrf.mxu1 }
 0x2ee   : > { %v523_v34 = vpop.f32.mrf.mxu1 }
 0x2f0   : > { %v1725_v35 = vpop.f32.mrf.mxu1 }
 0x2fd   : > { %600 = vrot.lane.b32.xlu1 %v2327_v25, %s2108_s10 }
 0x365   : > { %v528_v36 = vpop.xlane.xlu0 %527 }
 0x366   : > { %v532_v37 = vsub.f32 %v474_v26, %v528_v36 }
 0x368   : > { %v534_v38 = vmul.f32 1.442695, %v532_v37 }
 0x36a   : > { %1918 = vpow2.f32 %v534_v38 }
 0x375   : > { %v531_v41 = vpop.xlane.xlu1 %530 }
 0x376   : > { %v533_v42 = vsub.f32 %v520_v31, %v531_v41 }
 0x377   : > { %v1919_v43 = vpop.eup %1918 }
 0x378   : > { %v536_v44 = vmul.f32 1.442695, %v533_v42  ;;  %v538_v45 = vsel %vm432_vm3, %v1919_v43, 0.0 }
 0x379   : > { %539 = vadd.xlane.f32.xlu0 %v538_v45  ;;  %v601_v46 = vpop.permute.xlu1 %600 }
 0x37a   : > { %1920 = vpow2.f32 %v536_v44  ;;  %v606_v47 = vsel %vm436_vm2, %v601_v46, 0 }
 0x37b   : > { %1733 = vmatpush3.bf16.msra.mxu1 %v606_v47  ;;  %v428_v47 = vld [vmem:[#allocation7] sm:$0xf] }
 0x37c   : > { %1744 = vmatprep.subr.bf16.mxu1 %v2105_v0 }
 0x387   : > { %v1921_v48 = vpop.eup %1920 }
 0x388   : > { %v541_v49 = vsel %vm432_vm3, %v1921_v48, 0.0 }
 0x389   : > { %542 = vadd.xlane.f32.xlu0 %v541_v49 }
 0x39f   : > { %551 = vrot.lane.b32.xlu0 %v2314_v18, %s2108_s10  ;;  %s2491_s10 = scalar_lea.hbm %s2542_s5, %s1662_s29 }
 0x3a3   : > { %649 = vrot.lane.b32.xlu0 %v2314_v18, %s2109_s12 }
 0x3a7   : > { %699 = vrot.lane.b32.xlu0 %v2327_v25, %s2109_s12  ;;  %s2030_s12 = scalar_lea.vmem %s2493_s24, 256 }
 0x3a8   : > { %p2031_p5 = scmp.ne.s32.totalorder %s2493_s24, %s2030_s12 }
 0x3aa   : > { %p2032_p7 = pnand %p2031_p5, %p2559_p2 }
 0x3ac   : > { %p2033_p12 = pneg %p2032_p7 }
 0x402   : > { %v540_v50 = vpop.xlane.xlu0 %539 }
 0x403   : > { %1922 = vrcp.f32 %v540_v50  ;;  %v921_v50 = vsel %vm436_vm2, %v428_v47, 0 }
 0x410   : > { %v1923_v51 = vpop.eup %1922 }
 0x411   : > { %v546_v53 = vmul.f32 %v1923_v51, %v1919_v43  ;;  %v2396_v51 = vpack.c.bf16 %v2339_v40, %v2337_v39 }
 0x412   : > { %v543_v52 = vpop.xlane.xlu0 %542 }
 0x413   : > { %1924 = vrcp.f32 %v543_v52  ;;  %v548_v57 = vpack.c.bf16 %v546_v53, %v546_v53  ;;  %v1018_v52 = vsel %vm436_vm2, %v2396_v51, 0 }
 0x416   : > { %v552_v54 = vpop.permute.xlu0 %551 }
 0x417   : > { %v557_v56 = vsel %vm436_vm2, %v552_v54, 0  ;;  %v429_v54 = vld [vmem:[#allocation7 + $0x4] sm:$0xf] }
 0x418   : > { %1727 = vmatpush3.bf16.msra.mxu0 %v557_v56  ;;  %v874_v39 = vsel %vm436_vm2, %v429_v54, 0 }
 0x419   : > { %1738 = vmatprep.subr.bf16.mxu0 %v2105_v0 }
 0x41a   : > { %v650_v62 = vpop.permute.xlu0 %649 }
 0x41b   : > { %1729 = vmatmul.mubr.msk.bf16.vlgmr.msra.gmra.mxu0 %vm432_vm3, %v548_v57 }
 0x41c   : > { %1739 = vmatpush3.bf16.msra.mxu0 %v657_v58  ;;  %1740 = vmatprep.mubr.msk.bf16.mxu0 %vm2106_vm0, %v2105_v0 }
 0x41d   : > { %1750 = vmatprep.subr.bf16.mxu0 %v2105_v0 }
 0x41e   : > { %v700_v2 = vpop.permute.xlu0 %699 }
 0x420   : > { %v1925_v59 = vpop.eup %1924 }
 0x421   : > { %v547_v61 = vmul.f32 %v1925_v59, %v1921_v48 }
 0x423   : > { %1741 = vmatmul.mubr.msk.bf16.vlgmr.msra.gmra.mxu0 %vm432_vm3, %v650_v62  ;;  %v549_v63 = vpack.c.bf16 %v547_v61, %v547_v61  ;;  %v970_v61 = vsel %vm436_vm2, %v2321_v20, 0 }
 0x424   : > { %1752 = vmatprep.mubr.msk.bf16.mxu0 %vm2106_vm0, %v2105_v0 }
 0x425   : > { %1735 = vmatmul.mubr.msk.bf16.vlgmr.msra.gmra.mxu1 %vm432_vm3, %v549_v63 }
 0x426   : > { %1745 = vmatpush3.bf16.msra.mxu1 %v707_v1  ;;  %1746 = vmatprep.mubr.msk.bf16.mxu1 %vm2106_vm0, %v2105_v0 }
 0x427   : > { %1756 = vmatprep.subr.bf16.mxu1 %v2105_v0 }
 0x42d   : > { %1747 = vmatmul.mubr.msk.bf16.vlgmr.msra.gmra.mxu1 %vm432_vm3, %v700_v2 }
 0x42e   : > { %1758 = vmatprep.mubr.msk.bf16.mxu1 %vm2106_vm0, %v2105_v0 }
 0x4db   : > { %v2368_v3 = vpop.f32.mrf.mxu0 }
 0x4dd   : > { %v1730_v4 = vpop.f32.mrf.mxu0 }
 0x4df   : > { %v596_v5 = vpop.f32.mrf.mxu0 }
 0x4e1   : > { %v1731_v6 = vpop.f32.mrf.mxu0 }
 0x4e3   : > { %v693_v7 = vpop.f32.mrf.mxu0 }
 0x4e4   : > { %v749_v8 = vsel %vm432_vm3, %v693_v7, -inf }
 0x4e5   : > { %v2371_v9 = vpop.f32.mrf.mxu1  ;;  %750 = vmax.xlane.f32.xlu0 %v749_v8  ;;  %v1742_v10 = vpop.f32.mrf.mxu0 }
 0x4e6   : > { %v648_v11 = vpack.c.bf16 %v2371_v9, %v2368_v3 }
 0x4e7   : > { %v1736_v12 = vpop.f32.mrf.mxu1  ;;  %v696_v13 = vpop.f32.mrf.mxu0 }
 0x4e9   : > { %v645_v14 = vpop.f32.mrf.mxu1  ;;  %v1743_v15 = vpop.f32.mrf.mxu0 }
 0x4eb   : > { %v1737_v16 = vpop.f32.mrf.mxu1 }
 0x4ed   : > { %v743_v17 = vpop.f32.mrf.mxu1 }
 0x4ee   : > { %v752_v19 = vsel %vm432_vm3, %v743_v17, -inf }
 0x4ef   : > { %753 = vmax.xlane.f32.xlu1 %v752_v19  ;;  %v1748_v21 = vpop.f32.mrf.mxu1 }
 0x4f1   : > { %v746_v22 = vpop.f32.mrf.mxu1 }
 0x4f3   : > { %v1749_v23 = vpop.f32.mrf.mxu1 }
 0x500   : > { %821 = vrot.lane.b32.xlu1 %v2327_v25, %s2110_s13 }
 0x504   : > { %1012 = vrot.lane.b32.xlu1 %v2327_v25, %s2111_s14 }
 0x56e   : > { %v751_v24 = vpop.xlane.xlu0 %750 }
 0x56f   : > { %v755_v26 = vsub.f32 %v693_v7, %v751_v24 }
 0x571   : > { %v757_v27 = vmul.f32 1.442695, %v755_v26 }
 0x573   : > { %1926 = vpow2.f32 %v757_v27 }
 0x578   : > { %v754_v28 = vpop.xlane.xlu1 %753 }
 0x579   : > { %v756_v29 = vsub.f32 %v743_v17, %v754_v28 }
 0x57b   : > { %v759_v30 = vmul.f32 1.442695, %v756_v29 }
 0x57c   : > { %v822_v31 = vpop.permute.xlu1 %821 }
 0x57d   : > { %1928 = vpow2.f32 %v759_v30  ;;  %v827_v32 = vsel %vm436_vm2, %v822_v31, 0 }
 0x57e   : > { %1757 = vmatpush3.bf16.msra.mxu1 %v827_v32 }
 0x57f   : > { %1768 = vmatprep.subr.bf16.mxu1 %v2105_v0 }
 0x580   : > { %v1927_v33 = vpop.eup %1926  ;;  %v1013_v53 = vpop.permute.xlu1 %1012 }
 0x581   : > { %v761_v34 = vsel %vm432_vm3, %v1927_v33, 0.0 }
 0x582   : > { %762 = vadd.xlane.f32.xlu0 %v761_v34 }
 0x58a   : > { %v1929_v35 = vpop.eup %1928 }
 0x58b   : > { %v764_v36 = vsel %vm432_vm3, %v1929_v35, 0.0 }
 0x58c   : > { %765 = vadd.xlane.f32.xlu0 %v764_v36 }
 0x5a2   : > { %773 = vrot.lane.b32.xlu0 %v2314_v18, %s2110_s13  ;;  %s2115_s13 = smov [#allocation8]  }
 0x5a6   : > { %964 = vrot.lane.b32.xlu0 %v2314_v18, %s2111_s14  ;;  %s2034_s14 = sshll.u32 %s2115_s13, 4  ;;  %s2035_s14 = int_to_ptr.vmem [resolvable:$false] %s2034_s14 }
 0x5a7   : > { %p2037_p13 = scmp.lt.s32.totalorder %s2493_s24, %s2035_s14 }
 0x60b   : > { %v763_v37 = vpop.xlane.xlu0 %762 }
 0x60c   : > { %1930 = vrcp.f32 %v763_v37 }
 0x615   : > { %v766_v38 = vpop.xlane.xlu0 %765 }
 0x616   : > { %1932 = vrcp.f32 %v766_v38 }
 0x619   : > { %v1931_v41 = vpop.eup %1930  ;;  %v774_v42 = vpop.permute.xlu0 %773 }
 0x61a   : > { %v779_v43 = vsel %vm436_vm2, %v774_v42, 0  ;;  %v769_v44 = vmul.f32 %v1931_v41, %v1927_v33  ;;  %v1233_v42 = vrot.slane %v2321_v20, 4 }
 0x61b   : > { %1751 = vmatpush3.bf16.msra.mxu0 %v779_v43 }
 0x61c   : > { %v771_v45 = vpack.c.bf16 %v769_v44, %v769_v44  ;;  %1762 = vmatprep.subr.bf16.mxu0 %v2105_v0 }
 0x61d   : > { %v965_v2 = vpop.permute.xlu0 %964 }
 0x61e   : > { %1753 = vmatmul.mubr.msk.bf16.vlgmr.msra.gmra.mxu0 %vm432_vm3, %v771_v45  ;;  %v1238_v45 = vsel %vm436_vm2, %v1233_v42, 0 }
 0x61f   : > { %1764 = vmatprep.mubr.msk.bf16.mxu0 %vm2106_vm0, %v2105_v0  ;;  %1763 = vmatpush3.bf16.msra.mxu0 %v874_v39 }
 0x620   : > { %1774 = vmatprep.subr.bf16.mxu0 %v2105_v0 }
 0x623   : > { %v1933_v46 = vpop.eup %1932 }
 0x624   : > { %v770_v48 = vmul.f32 %v1933_v46, %v1929_v35 }
 0x626   : > { %v772_v49 = vpack.c.bf16 %v770_v48, %v770_v48 }
 0x628   : > { %1759 = vmatmul.mubr.msk.bf16.vlgmr.msra.gmra.mxu1 %vm432_vm3, %v772_v49  ;;  %v430_v49 = vld [vmem:[#allocation7 + $0x8] sm:$0xf] }
 0x629   : > { %1769 = vmatpush3.bf16.msra.mxu1 %v921_v50  ;;  %1770 = vmatprep.mubr.msk.bf16.mxu1 %vm2106_vm0, %v2105_v0  ;;  %v1185_v50 = vsel %vm436_vm2, %v430_v49, 0 }
 0x62a   : > { %1780 = vmatprep.subr.bf16.mxu1 %v2105_v0 }
 0x630   : > { %1771 = vmatmul.mubr.msk.bf16.vlgmr.msra.gmra.mxu1 %vm432_vm3, %v648_v11 }
 0x631   : > { %1781 = vmatpush3.bf16.msra.mxu1 %v1018_v52  ;;  %1782 = vmatprep.mubr.msk.bf16.mxu1 %vm2106_vm0, %v2105_v0 }
 0x632   : > { %1792 = vmatprep.subr.bf16.mxu1 %v2105_v0 }
 0x638   : > { %1783 = vmatmul.mubr.msk.bf16.vlgmr.msra.gmra.mxu1 %vm432_vm3, %v1013_v53 }
 0x639   : > { %1794 = vmatprep.mubr.msk.bf16.mxu1 %vm2106_vm0, %v2105_v0 }
 0x6de   : > { %v815_v40 = vpop.f32.mrf.mxu0 }
 0x6e0   : > { %v1754_v55 = vpop.f32.mrf.mxu0 }
 0x6e1   : > { %v1283_v55 = vrot.slane %v2396_v51, 4 }
 0x6e2   : > { %v818_v56 = vpop.f32.mrf.mxu0 }
 0x6e4   : > { %v1755_v57 = vpop.f32.mrf.mxu0 }
 0x6e8   : > { %v863_v58 = vpop.f32.mrf.mxu1 }
 0x6e9   : > { %v869_v59 = vpack.c.bf16 %v863_v58, %v815_v40 }
 0x6ea   : > { %v1760_v60 = vpop.f32.mrf.mxu1 }
 0x6eb   : > { %1765 = vmatmul.mubr.msk.bf16.vlgmr.msra.gmra.mxu0 %vm432_vm3, %v869_v59 }
 0x6ec   : > { %1775 = vmatpush3.bf16.msra.mxu0 %v970_v61  ;;  %v866_v62 = vpop.f32.mrf.mxu1  ;;  %1776 = vmatprep.mubr.msk.bf16.mxu0 %vm2106_vm0, %v2105_v0 }
 0x6ed   : > { %1786 = vmatprep.subr.bf16.mxu0 %v2105_v0  ;;  %v1288_v62 = vsel %vm436_vm2, %v1283_v55, 0 }
 0x6ee   : > { %v1761_v63 = vpop.f32.mrf.mxu1 }
 0x6f0   : > { %v2415_v1 = vpop.f32.mrf.mxu1 }
 0x6f2   : > { %v1772_v3 = vpop.f32.mrf.mxu1 }
 0x6f3   : > { %1777 = vmatmul.mubr.msk.bf16.vlgmr.msra.gmra.mxu0 %vm432_vm3, %v965_v2 }
 0x6f4   : > { %v2418_v4 = vpop.f32.mrf.mxu1  ;;  %1788 = vmatprep.mubr.msk.bf16.mxu0 %vm2106_vm0, %v2105_v0 }
 0x6f6   : > { %v1773_v5 = vpop.f32.mrf.mxu1 }
 0x6f8   : > { %v1054_v6 = vpop.f32.mrf.mxu1 }
 0x6f9   : > { %v1063_v7 = vsel %vm432_vm3, %v1054_v6, -inf }
 0x6fa   : > { %1064 = vmax.xlane.f32.xlu1 %v1063_v7  ;;  %v1784_v8 = vpop.f32.mrf.mxu1 }
 0x6fc   : > { %v1057_v9 = vpop.f32.mrf.mxu1 }
 0x6fe   : > { %v1785_v10 = vpop.f32.mrf.mxu1 }
 0x70b   : > { %1084 = vrot.lane.b32.xlu1 %v2314_v18, %s2112_s7 }
 0x70f   : > { %1230 = vrot.lane.b32.xlu1 %v2314_v18, %s2113_s28 }
 0x713   : > { %1280 = vrot.lane.b32.xlu1 %v2327_v25, %s2113_s28 }
 0x783   : > { %v1065_v11 = vpop.xlane.xlu1 %1064 }
 0x784   : > { %v1067_v14 = vsub.f32 %v1054_v6, %v1065_v11 }
 0x786   : > { %v1070_v15 = vmul.f32 1.442695, %v1067_v14 }
 0x787   : > { %v1085_v12 = vpop.permute.xlu1 %1084 }
 0x788   : > { %v1090_v13 = vsel %vm436_vm2, %v1085_v12, 0  ;;  %1934 = vpow2.f32 %v1070_v15 }
 0x789   : > { %1787 = vmatpush3.bf16.msra.mxu0 %v1090_v13 }
 0x78a   : > { %1798 = vmatprep.subr.bf16.mxu0 %v2105_v0 }
 0x78b   : > { %v1231_v48 = vpop.permute.xlu1 %1230 }
 0x78f   : > { %v1281_v3 = vpop.permute.xlu1 %1280 }
 0x795   : > { %v1935_v24 = vpop.eup %1934 }
 0x796   : > { %v1075_v28 = vsel %vm432_vm3, %v1935_v24, 0.0 }
 0x7ab   : > { %v2429_v16 = vpop.f32.mrf.mxu0 }
 0x7ac   : > { %v958_v10 = vadd.f32 %v2415_v1, %v2429_v16 }
 0x7ad   : > { %v1766_v17 = vpop.f32.mrf.mxu0 }
 0x7af   : > { %v2431_v19 = vpop.f32.mrf.mxu0 }
 0x7b0   : > { %v961_v14 = vadd.f32 %v2418_v4, %v2431_v19 }
 0x7b1   : > { %v1767_v21 = vpop.f32.mrf.mxu0 }
 0x7b3   : > { %v1006_v22 = vpop.f32.mrf.mxu0 }
 0x7b4   : > { %v1060_v23 = vsel %vm432_vm3, %v1006_v22, -inf }
 0x7b5   : > { %1061 = vmax.xlane.f32.xlu0 %v1060_v23  ;;  %v1778_v26 = vpop.f32.mrf.mxu0 }
 0x7b7   : > { %v1009_v27 = vpop.f32.mrf.mxu0 }
 0x7b9   : > { %1076 = vadd.xlane.f32.xlu0 %v1075_v28  ;;  %v1779_v29 = vpop.f32.mrf.mxu0 }
 0x83e   : > { %v1062_v30 = vpop.xlane.xlu0 %1061 }
 0x83f   : > { %v1066_v31 = vsub.f32 %v1006_v22, %v1062_v30 }
 0x841   : > { %v1068_v32 = vmul.f32 1.442695, %v1066_v31 }
 0x842   : > { %v1077_v35 = vpop.xlane.xlu0 %1076 }
 0x843   : > { %1936 = vpow2.f32 %v1068_v32 }
 0x844   : > { %1938 = vrcp.f32 %v1077_v35 }
 0x850   : > { %v1937_v33 = vpop.eup %1936 }
 0x851   : > { %v1072_v34 = vsel %vm432_vm3, %v1937_v33, 0.0  ;;  %v1939_v36 = vpop.eup %1938 }
 0x852   : > { %1073 = vadd.xlane.f32.xlu0 %v1072_v34  ;;  %v1081_v38 = vmul.f32 %v1939_v36, %v1935_v24 }
 0x854   : > { %v1083_v44 = vpack.c.bf16 %v1081_v38, %v1081_v38 }
 0x868   : > { %1132 = vrot.lane.b32.xlu0 %v2327_v25, %s2112_s7  ;;  %s2036_s7 = scalar_lea.vmem %s2035_s14, 512 }
 0x869   : > { %p2038_p0 = scmp.lt.s32.totalorder %s2036_s7, %s2030_s12 }
 0x86b   : > { %p2039_p10 = por %p2038_p0, %p2037_p13 }
 0x86d   : > { %p2040_p3 = pnand %p2039_p10, %p2033_p12 }
 0x8db   : > { %v1074_v37 = vpop.xlane.xlu0 %1073 }
 0x8dc   : > { %1940 = vrcp.f32 %v1074_v37 }
 0x8df   : > { %v1133_v41 = vpop.permute.xlu0 %1132 }
 0x8e0   : > { %v1138_v43 = vsel %vm436_vm2, %v1133_v41, 0 }
 0x8e1   : > { %1793 = vmatpush3.bf16.msra.mxu1 %v1138_v43 }
 0x8e2   : > { %1804 = vmatprep.subr.bf16.mxu1 %v2105_v0 }
 0x8e4   : > { %1795 = vmatmul.mubr.msk.bf16.vlgmr.msra.gmra.mxu1 %vm432_vm3, %v1083_v44 }
 0x8e5   : > { %1805 = vmatpush3.bf16.msra.mxu1 %v1238_v45  ;;  %1806 = vmatprep.mubr.msk.bf16.mxu1 %vm2106_vm0, %v2105_v0  ;;  %v431_v45 = vld [vmem:[#allocation7 + $0xc] sm:$0xf] }
 0x8e6   : > { %1816 = vmatprep.subr.bf16.mxu1 %v2105_v0 }
 0x8e9   : > { %v1941_v46 = vpop.eup %1940 }
 0x8ea   : > { %v1080_v47 = vmul.f32 %v1941_v46, %v1937_v33 }
 0x8ec   : > { %1807 = vmatmul.mubr.msk.bf16.vlgmr.msra.gmra.mxu1 %vm432_vm3, %v1231_v48  ;;  %v1082_v20 = vpack.c.bf16 %v1080_v47, %v1080_v47 }
 0x8ed   : > { %1818 = vmatprep.mubr.msk.bf16.mxu1 %vm2106_vm0, %v2105_v0 }
 0x8ee   : > { %1789 = vmatmul.mubr.msk.bf16.vlgmr.msra.gmra.mxu0 %vm432_vm3, %v1082_v20 }
 0x8ef   : > { %1800 = vmatprep.mubr.msk.bf16.mxu0 %vm2106_vm0, %v2105_v0  ;;  %1799 = vmatpush3.bf16.msra.mxu0 %v1185_v50 }
 0x8f0   : > { %1810 = vmatprep.subr.bf16.mxu0 %v2105_v0 }
 0x9a4   : > { %v1174_v52 = vpop.f32.mrf.mxu1 }
 0x9a6   : > { %v1796_v53 = vpop.f32.mrf.mxu1 }
 0x9a8   : > { %v1177_v54 = vpop.f32.mrf.mxu1 }
 0x9aa   : > { %v1797_v39 = vpop.f32.mrf.mxu1 }
 0x9ac   : > { %v1274_v40 = vpop.f32.mrf.mxu1 }
 0x9ad   : > { %v1330_v56 = vsel %vm432_vm3, %v1274_v40, -inf }
 0x9ae   : > { %1331 = vmax.xlane.f32.xlu0 %v1330_v56  ;;  %v1126_v57 = vpop.f32.mrf.mxu0  ;;  %v1808_v58 = vpop.f32.mrf.mxu1 }
 0x9af   : > { %v1180_v59 = vpack.c.bf16 %v1174_v52, %v1126_v57  ;;  %v1655_v52 = vld [vmem:[%s2541_s4] ss:$0 sm:$0xff] }
 0x9b0   : > { %v1790_v60 = vpop.f32.mrf.mxu0  ;;  %v1277_v61 = vpop.f32.mrf.mxu1 }
 0x9b1   : > { %1801 = vmatmul.mubr.msk.bf16.vlgmr.msra.gmra.mxu0 %vm432_vm3, %v1180_v59 }
 0x9b2   : > { %1811 = vmatpush3.bf16.msra.mxu0 %v1288_v62  ;;  %v1129_v63 = vpop.f32.mrf.mxu0  ;;  %v1809_v2 = vpop.f32.mrf.mxu1  ;;  %1812 = vmatprep.mubr.msk.bf16.mxu0 %vm2106_vm0, %v2105_v0 }
 0x9b3   : > { %1822 = vmatprep.subr.bf16.mxu0 %v2105_v0 }
 0x9b4   : > { %v1791_v51 = vpop.f32.mrf.mxu0 }
 0x9b9   : > { %1813 = vmatmul.mubr.msk.bf16.vlgmr.msra.gmra.mxu0 %vm432_vm3, %v1281_v3 }
 0x9ba   : > { %1824 = vmatprep.mubr.msk.bf16.mxu0 %vm2106_vm0, %v2105_v0 }
 0xa37   : > { %v1332_v5 = vpop.xlane.xlu0 %1331 }
 0xa38   : > { %v1336_v6 = vsub.f32 %v1274_v40, %v1332_v5 }
 0xa3a   : > { %v1338_v7 = vmul.f32 1.442695, %v1336_v6 }
 0xa3c   : > { %1942 = vpow2.f32 %v1338_v7 }
 0xa49   : > { %v1943_v8 = vpop.eup %1942 }
 0xa4a   : > { %v1342_v9 = vsel %vm432_vm3, %v1943_v8, 0.0 }
 0xa4b   : > { %1343 = vadd.xlane.f32.xlu0 %v1342_v9 }
 0xa71   : > { %v1221_v11 = vpop.f32.mrf.mxu0 }
 0xa72   : > { %v1228_v12 = vadd.f32 %v1221_v11, %v958_v10 }
 0xa73   : > { %v1802_v13 = vpop.f32.mrf.mxu0 }
 0xa75   : > { %v1224_v15 = vpop.f32.mrf.mxu0 }
 0xa76   : > { %v1229_v17 = vadd.f32 %v1224_v15, %v961_v14 }
 0xa77   : > { %v1803_v21 = vpop.f32.mrf.mxu0 }
 0xa79   : > { %v1324_v22 = vpop.f32.mrf.mxu0 }
 0xa7a   : > { %v1333_v23 = vsel %vm432_vm3, %v1324_v22, -inf }
 0xa7b   : > { %1334 = vmax.xlane.f32.xlu1 %v1333_v23  ;;  %v1814_v24 = vpop.f32.mrf.mxu0 }
 0xa7d   : > { %v1327_v26 = vpop.f32.mrf.mxu0 }
 0xa7f   : > { %v1815_v27 = vpop.f32.mrf.mxu0 }
 0xa8c   : > { %1354 = vrot.lane.b32.xlu1 %v2314_v18, %s2114_s11 }
 0xad4   : > { %v1344_v1 = vpop.xlane.xlu0 %1343 }
 0xad5   : > { %1944 = vrcp.f32 %v1344_v1 }
 0xae2   : > { %v1945_v16 = vpop.eup %1944 }
 0xae3   : > { %v1350_v4 = vmul.f32 %v1945_v16, %v1943_v8 }
 0xae5   : > { %v1352_v32 = vpack.c.bf16 %v1350_v4, %v1350_v4 }
 0xb04   : > { %v1335_v28 = vpop.xlane.xlu1 %1334 }
 0xb05   : > { %v1337_v29 = vsub.f32 %v1324_v22, %v1335_v28 }
 0xb07   : > { %v1340_v30 = vmul.f32 1.442695, %v1337_v29 }
 0xb08   : > { %v1355_v19 = vpop.permute.xlu1 %1354 }
 0xb09   : > { %1946 = vpow2.f32 %v1340_v30  ;;  %v1360_v31 = vsel %vm436_vm2, %v1355_v19, 0 }
 0xb0a   : > { %1817 = vmatpush3.bf16.msra.mxu1 %v1360_v31 }
 0xb0b   : > { %1828 = vmatprep.subr.bf16.mxu1 %v2105_v0 }
 0xb0d   : > { %1819 = vmatmul.mubr.msk.bf16.vlgmr.msra.gmra.mxu1 %vm432_vm3, %v1352_v32 }
 0xb0e   : > { %1830 = vmatprep.mubr.msk.bf16.mxu1 %vm2106_vm0, %v2105_v0 }
 0xb16   : > { %v1947_v18 = vpop.eup %1946 }
 0xb17   : > { %v1345_v33 = vsel %vm432_vm3, %v1947_v18, 0.0 }
 0xb18   : > { %1346 = vadd.xlane.f32.xlu0 %v1345_v33 }
 0xb2e   : > { %1402 = vrot.lane.b32.xlu0 %v2327_v25, %s2114_s11  ;;  %v1455_v25 = vsel %vm436_vm2, %v431_v45, 0 }
 0xb2f   : > { %1829 = vmatpush3.bf16.msra.mxu1 %v1455_v25 }
 0xba1   : > { %v1347_v34 = vpop.xlane.xlu0 %1346 }
 0xba2   : > { %1948 = vrcp.f32 %v1347_v34 }
 0xba5   : > { %v1403_v35 = vpop.permute.xlu0 %1402 }
 0xba6   : > { %v1408_v36 = vsel %vm436_vm2, %v1403_v35, 0 }
 0xba7   : > { %1823 = vmatpush3.bf16.msra.mxu0 %v1408_v36 }
 0xbaf   : > { %v1949_v37 = vpop.eup %1948 }
 0xbb0   : > { %v1351_v38 = vmul.f32 %v1949_v37, %v1947_v18 }
 0xbb2   : > { %v1353_v41 = vpack.c.bf16 %v1351_v38, %v1351_v38 }
 0xbb4   : > { %1825 = vmatmul.mubr.msk.bf16.vlgmr.msra.gmra.mxu0 %vm432_vm3, %v1353_v41 }
 0xbcd   : > { %v1396_v42 = vpop.f32.mrf.mxu1 }
 0xbcf   : > { %v1820_v0 = vpop.f32.mrf.mxu1 }
 0xbd1   : > { %v1399_v43 = vpop.f32.mrf.mxu1 }
 0xbd3   : > { %v1821_v44 = vpop.f32.mrf.mxu1 }
 0xc74   : > { %v1444_v46 = vpop.f32.mrf.mxu0 }
 0xc75   : > { %v1450_v47 = vpack.c.bf16 %v1444_v46, %v1396_v42 }
 0xc76   : > { %v1826_v48 = vpop.f32.mrf.mxu0 }
 0xc77   : > { %1831 = vmatmul.mubr.msk.bf16.vlgmr.msra.gmra.mxu1 %vm432_vm3, %v1450_v47 }
 0xc78   : > { %v1447_v20 = vpop.f32.mrf.mxu0 }
 0xc7a   : > { %v1827_v49 = vpop.f32.mrf.mxu0 }
 0xd37   : > { %v1491_v50 = vpop.f32.mrf.mxu1 }
 0xd38   : > { %v1498_v53 = vadd.f32 %v1491_v50, %v1228_v12 }
 0xd39   : > { %v1832_v54 = vpop.f32.mrf.mxu1 }
 0xd3a   : > { %v1507_v39 = vadd.f32 %v1655_v52, %v1498_v53 }
 0xd3b   : > { %v1494_v40 = vpop.f32.mrf.mxu1 }
 0xd3c   : > { %1509 = vst.msk [vmem:[%s271_s6] sm:$0xff] %vm305_vm1, %v1507_v39  ;;  %v1499_v55 = vadd.f32 %v1494_v40, %v1229_v17 }
 0xd3d   : > { %v1833_v56 = vpop.f32.mrf.mxu1 }
 0xd3e   : > { %v1508_v57 = vadd.f32 %v1655_v52, %v1499_v55 }
 0xd40   : > { %1510 = vst.msk [vmem:[%s271_s6 + $0x8] sm:$0xff] %vm305_vm1, %v1508_v57 }
 0xd41   : > { %2043 = shalt.err (!%p2040_p3)
}
 0xd42   : > { %s2044_s28 = scalar_lea.hbm %s2491_s10, 256  ;;  %s2048_s16 = scalar_lea.hbm %s2542_s5, 512 }
 0xd43   : > { %p2045_p11 = scmp.ne.s32.totalorder %s2491_s10, %s2044_s28  ;;  %p2049_p4 = scmp.lt.s32.totalorder %s2491_s10, %s2542_s5 }
 0xd44   : > { %p2050_p6 = scmp.lt.s32.totalorder %s2048_s16, %s2044_s28 }
 0xd45   : > { %p2046_p9 = pnand %p2045_p11, %p2559_p2 }
 0xd46   : > { %p2051_p8 = por %p2050_p6, %p2049_p4 }
 0xd47   : > { %p2047_p1 = pneg %p2046_p9 }
 0xd49   : > { %p2052_p5 = pnand %p2051_p8, %p2047_p1 }
 0xd4b   : > { %2055 = shalt.err (!%p2052_p5)
}
 0xd4c   : > { %s2116_s6 = smov 128   ;;  %s2117_s26 = smov 8  }
 0xd4d   : > { %1844 = dma.vmem_to_hbm [thread:$0]  (%p2559_p2), %s2493_s24, 256, %s2491_s10, %s1512_s22, %s2116_s6, %s2116_s6, %s2117_s26  }
 0xd4e PF: > { %s1540_s9 = sand.u32 1, %s2086_s18   ;;  %p2560_p7 = scmp.ne.s32.totalorder %s2549_s25, 0 }
 0xd4f   : > { %p2561_p12 = scmp.ge.s32.totalorder %s2098_s21, 2  ;;  %s1541_s12 = scalar_lea.sflag [#allocation4], %s1540_s9 }
 0xd51   : > { %p1858_p13 = pnand %p2561_p12, %p2560_p7 }
 0xd53   : > { %p1859_p0 = pneg %p1858_p13 }
 0xd55   : > { %2081 = dma.done.wait (%p1859_p0), %s1541_s12, 256  }
 0xd56   : > { %2083 = vsyncadd (%p1859_p0), %s1541_s12, 4294967040  ;;  %p19_p10 = scmp.ge.s32.totalorder %s2226_s15, 4   ;;  %s2562_s18 = smov %s2090_s19 }
 0xd57   : > { %s2563_s19 = smov %s2094_s20  ;;  %s2564_s20 = smov %s2242_s27 }
 0xd58   : > { %s2565_s21 = smov %s2226_s15  ;;  %21 = sbr.rel (!%p19_p10) target bundleno = 6 (0x6), region = 93 }
 0xd5d   :  { %1546 = vsyncpa [#allocation3], 1 }
 0xd5e   :  { %1548 = vsyncpa [#allocation3 + $0x1], 1 }
 0xd5f   :  { %1549 = vsyncpa [#allocation6], 1 }
 0xd60   :  { %1550 = vsyncpa [#allocation4], 1 }
 0xd61   :  { %1552 = vsyncpa [#allocation4 + $0x1], 1 }

</bundles_post_ra>
